<compile_context>
chip_gen: v7x
topology: tpu7x:2x2x1
jax: 0.10.0
libtpu: 0.0.40
codegen_flags: <defaults>
</compile_context>

<pallas_src>
import jax
import jax.numpy as jnp
from jax.experimental import pallas as pl
from jax.experimental.pallas import tpu as pltpu

VISUAL_ENCODE_LEN = 128   # obs_encoder output width
X_DIM = 128               # second half of tau
HIDDEN_DIM = 128
LATENT_DIM = 64


# ----------------------------------------------------------------------------
# Fused kernel: obs_encoder(obs), obs_encoder(next_obs), posterior MLP,
#               reparameterize, KL reduction.
# ----------------------------------------------------------------------------
def _cvae_fused_kernel(obs_ref, nobs_ref, enc_w_ref, enc_b_ref,
                       w1a_ref, w1b_ref, b1_ref, wh_ref, bh_ref, eps_ref,
                       ml_ref, z_ref, kl_ref):
    # --- obs_encoder on both observations; encoder weights resident in VMEM once.
    enc_w = enc_w_ref[...]
    enc_b = enc_b_ref[...]
    enc0 = jnp.maximum(
        jnp.dot(obs_ref[...], enc_w, preferred_element_type=jnp.float32) + enc_b,
        0.0)
    enc1 = jnp.maximum(
        jnp.dot(nobs_ref[...], enc_w, preferred_element_type=jnp.float32) + enc_b,
        0.0)

    # --- fc1 over tau = [enc0 | enc1] WITHOUT materializing the concat:
    #     tau @ W1 == enc0 @ W1[:128, :] + enc1 @ W1[128:, :]
    h = (jnp.dot(enc0, w1a_ref[...], preferred_element_type=jnp.float32)
         + jnp.dot(enc1, w1b_ref[...], preferred_element_type=jnp.float32)
         + b1_ref[...])
    h = jnp.maximum(h, 0.0)

    # --- merged mean/log_var head: ONE 128-wide MXU matmul, lane-dense store.
    ml = jnp.dot(h, wh_ref[...], preferred_element_type=jnp.float32) + bh_ref[...]
    ml_ref[...] = ml
    z_mean = ml[:, :LATENT_DIM]
    z_lvar = ml[:, LATENT_DIM:]

    # --- reparameterize; single exp on the EUP, exp(log_var) reused as e*e.
    e = jnp.exp(0.5 * z_lvar)
    z_ref[...] = z_mean + e * eps_ref[...]

    # --- KL divergence, mean over all elements.
    kl = -0.5 * (1.0 + z_lvar - z_mean * z_mean - e * e)
    n = kl.shape[0] * kl.shape[1]
    kl_sum = jnp.sum(jnp.sum(kl, axis=1, keepdims=True), axis=0, keepdims=True)
    kl_ref[...] = kl_sum / jnp.float32(n)


# ----------------------------------------------------------------------------
# Full TaskCVAEModel.forward (single pallas_call)
# ----------------------------------------------------------------------------
def task_cvae_forward(obs, next_obs, params, eps, eval_mode=False):
    B = obs.shape[0]
    # if next_obs is 3-D, add the channel dim (NCHW with C=1) like the PyTorch code
    if next_obs.ndim == 3:
        next_obs = next_obs[:, None, :, :]
    obs_flat = obs.reshape(B, -1)        # (B, C*H*W), row-major flatten
    nobs_flat = next_obs.reshape(B, -1)  # (B, C*H*W)

    vmem = pl.BlockSpec(memory_space=pltpu.MemorySpace.VMEM)
    out_shapes = (
        jax.ShapeDtypeStruct((B, 2 * LATENT_DIM), jnp.float32),  # [mean | logvar]
        jax.ShapeDtypeStruct((B, LATENT_DIM), jnp.float32),      # z
        jax.ShapeDtypeStruct((1, 1), jnp.float32),               # kl (scalar)
    )
    ml, z, kl = pl.pallas_call(
        _cvae_fused_kernel,
        out_shape=out_shapes,
        in_specs=[vmem] * 10,
        out_specs=(vmem, vmem, vmem),
    )(obs_flat, nobs_flat,
      params["enc_w"], params["enc_b"],
      params["w1a"], params["w1b"], params["b1"],
      params["wh"], params["bh"], eps)

    z_mean = ml[:, :LATENT_DIM]
    z_log_var = ml[:, LATENT_DIM:]
    # TODO(synk): eval=True branch of the PyTorch module replaces z with fresh
    # N(0,1) noise drawn on device; not exercised here (eval_mode=False default).
    return kl[0, 0], (z_mean, z_log_var), z


# ----------------------------------------------------------------------------
# Deterministic parameter / input construction + reference + smoke test
# ----------------------------------------------------------------------------
def _init_params(key, in_dim):
    ks = jax.random.split(key, 8)
    s = 0.05
    # Encoder: Linear(in_dim, 128).  Posterior: w1 stored pre-split into the
    # two 128-row halves (top -> obs_encode, bottom -> next_obs_encode); the
    # two 64-wide heads stored pre-merged as one (128, 128) weight / (1, 128)
    # bias with columns [mean(64) | logvar(64)].
    params = {
        "enc_w": s * jax.random.normal(ks[0], (in_dim, VISUAL_ENCODE_LEN), jnp.float32),
        "enc_b": s * jax.random.normal(ks[1], (1, VISUAL_ENCODE_LEN), jnp.float32),
        "w1a": s * jax.random.normal(ks[2], (VISUAL_ENCODE_LEN, HIDDEN_DIM), jnp.float32),
        "w1b": s * jax.random.normal(ks[3], (X_DIM, HIDDEN_DIM), jnp.float32),
        "b1": s * jax.random.normal(ks[4], (1, HIDDEN_DIM), jnp.float32),
        "wh": s * jax.random.normal(ks[5], (HIDDEN_DIM, 2 * LATENT_DIM), jnp.float32),
        "bh": s * jax.random.normal(ks[6], (1, 2 * LATENT_DIM), jnp.float32),
    }
    return params


def _reference(obs, next_obs, params, eps):
    def enc(x):
        h = x.reshape(x.shape[0], -1) @ params["enc_w"] + params["enc_b"]
        return jnp.maximum(h, 0.0)
    if next_obs.ndim == 3:
        next_obs = next_obs[:, None, :, :]
    obs_e = enc(obs)
    nobs_e = enc(next_obs)
    w1 = jnp.concatenate([params["w1a"], params["w1b"]], axis=0)
    tau = jnp.concatenate([obs_e, nobs_e], axis=-1)
    h = jnp.maximum(tau @ w1 + params["b1"], 0.0)
    head = h @ params["wh"] + params["bh"]
    m = head[:, :LATENT_DIM]
    lv = head[:, LATENT_DIM:]
    z = m + jnp.exp(0.5 * lv) * eps
    kl = jnp.mean(-0.5 * (1.0 + lv - m * m - jnp.exp(lv)))
    return kl, m, lv, z


if __name__ == "__main__":
    key = jax.random.PRNGKey(0)
    k_obs, k_next, k_eps, k_par = jax.random.split(key, 4)

    B, C, H, W = 2, 1, 16, 16
    obs = jax.random.normal(k_obs, (B, C, H, W), jnp.float32)        # NCHW
    next_obs = jax.random.normal(k_next, (B, H, W), jnp.float32)     # 3-D -> unsqueeze path
    eps = jax.random.normal(k_eps, (B, LATENT_DIM), jnp.float32)     # reparameterize noise

    params = _init_params(k_par, C * H * W)

    fwd = jax.jit(task_cvae_forward, static_argnames=("eval_mode",))
    kl, (z_mean, z_log_var), z = fwd(obs, next_obs, params, eps, eval_mode=False)
    jax.block_until_ready((kl, z_mean, z_log_var, z))

    # quick correctness check against a plain-JAX reference
    kl_r, m_r, lv_r, z_r = _reference(obs, next_obs, params, eps)
    assert jnp.allclose(kl, kl_r, atol=1e-4), (kl, kl_r)
    assert jnp.allclose(z_mean, m_r, atol=1e-4)
    assert jnp.allclose(z_log_var, lv_r, atol=1e-4)
    assert jnp.allclose(z, z_r, atol=1e-4)

    print("KERNEL_OK")
</pallas_src>

<mosaic_0001>
module attributes {stable_mosaic.version = 11 : i64} {
  func.func @_cvae_fused_kernel(%arg0: memref<2x256xf32, #tpu.memory_space<vmem>>, %arg1: memref<2x256xf32, #tpu.memory_space<vmem>>, %arg2: memref<256x128xf32, #tpu.memory_space<vmem>>, %arg3: memref<1x128xf32, #tpu.memory_space<vmem>>, %arg4: memref<128x128xf32, #tpu.memory_space<vmem>>, %arg5: memref<128x128xf32, #tpu.memory_space<vmem>>, %arg6: memref<1x128xf32, #tpu.memory_space<vmem>>, %arg7: memref<128x128xf32, #tpu.memory_space<vmem>>, %arg8: memref<1x128xf32, #tpu.memory_space<vmem>>, %arg9: memref<2x64xf32, #tpu.memory_space<vmem>>, %arg10: memref<2x128xf32, #tpu.memory_space<vmem>>, %arg11: memref<2x64xf32, #tpu.memory_space<vmem>>, %arg12: memref<1x1xf32, #tpu.memory_space<vmem>>) attributes {dimension_semantics = [], scalar_prefetch = 0 : i64, scratch_operands = 0 : i64, tpu.core_type = #tpu.core_type<tc>} {
    %c0 = arith.constant 0 : index
    %c0_0 = arith.constant 0 : index
    %0 = vector.load %arg2[%c0, %c0_0] : memref<256x128xf32, #tpu.memory_space<vmem>>, vector<256x128xf32>
    %c0_1 = arith.constant 0 : index
    %c0_2 = arith.constant 0 : index
    %1 = vector.load %arg3[%c0_1, %c0_2] : memref<1x128xf32, #tpu.memory_space<vmem>>, vector<1x128xf32>
    %c0_3 = arith.constant 0 : index
    %c0_4 = arith.constant 0 : index
    %2 = vector.load %arg0[%c0_3, %c0_4] : memref<2x256xf32, #tpu.memory_space<vmem>>, vector<2x256xf32>
    %cst = arith.constant dense<0.000000e+00> : vector<2x128xf32>
    %3 = tpu.matmul %2, %0, %cst {dimension_numbers = #tpu.dot_dimension_numbers<[1], [0], [0], [1], [0, 0, 1, 1], [], []>} : vector<2x256xf32>, vector<256x128xf32>, vector<2x128xf32> -> vector<2x128xf32>
    %4 = vector.broadcast %1 : vector<1x128xf32> to vector<2x128xf32>
    %5 = arith.addf %3, %4 : vector<2x128xf32>
    %cst_5 = arith.constant 0.000000e+00 : f32
    %6 = vector.broadcast %cst_5 : f32 to vector<2x128xf32>
    %7 = arith.maximumf %5, %6 : vector<2x128xf32>
    %c0_6 = arith.constant 0 : index
    %c0_7 = arith.constant 0 : index
    %8 = vector.load %arg1[%c0_6, %c0_7] : memref<2x256xf32, #tpu.memory_space<vmem>>, vector<2x256xf32>
    %cst_8 = arith.constant dense<0.000000e+00> : vector<2x128xf32>
    %9 = tpu.matmul %8, %0, %cst_8 {dimension_numbers = #tpu.dot_dimension_numbers<[1], [0], [0], [1], [0, 0, 1, 1], [], []>} : vector<2x256xf32>, vector<256x128xf32>, vector<2x128xf32> -> vector<2x128xf32>
    %10 = vector.broadcast %1 : vector<1x128xf32> to vector<2x128xf32>
    %11 = arith.addf %9, %10 : vector<2x128xf32>
    %cst_9 = arith.constant 0.000000e+00 : f32
    %12 = vector.broadcast %cst_9 : f32 to vector<2x128xf32>
    %13 = arith.maximumf %11, %12 : vector<2x128xf32>
    %c0_10 = arith.constant 0 : index
    %c0_11 = arith.constant 0 : index
    %14 = vector.load %arg4[%c0_10, %c0_11] : memref<128x128xf32, #tpu.memory_space<vmem>>, vector<128x128xf32>
    %cst_12 = arith.constant dense<0.000000e+00> : vector<2x128xf32>
    %15 = tpu.matmul %7, %14, %cst_12 {dimension_numbers = #tpu.dot_dimension_numbers<[1], [0], [0], [1], [0, 0, 1, 1], [], []>} : vector<2x128xf32>, vector<128x128xf32>, vector<2x128xf32> -> vector<2x128xf32>
    %c0_13 = arith.constant 0 : index
    %c0_14 = arith.constant 0 : index
    %16 = vector.load %arg5[%c0_13, %c0_14] : memref<128x128xf32, #tpu.memory_space<vmem>>, vector<128x128xf32>
    %cst_15 = arith.constant dense<0.000000e+00> : vector<2x128xf32>
    %17 = tpu.matmul %13, %16, %cst_15 {dimension_numbers = #tpu.dot_dimension_numbers<[1], [0], [0], [1], [0, 0, 1, 1], [], []>} : vector<2x128xf32>, vector<128x128xf32>, vector<2x128xf32> -> vector<2x128xf32>
    %18 = arith.addf %15, %17 : vector<2x128xf32>
    %c0_16 = arith.constant 0 : index
    %c0_17 = arith.constant 0 : index
    %19 = vector.load %arg6[%c0_16, %c0_17] : memref<1x128xf32, #tpu.memory_space<vmem>>, vector<1x128xf32>
    %20 = vector.broadcast %19 : vector<1x128xf32> to vector<2x128xf32>
    %21 = arith.addf %18, %20 : vector<2x128xf32>
    %cst_18 = arith.constant 0.000000e+00 : f32
    %22 = vector.broadcast %cst_18 : f32 to vector<2x128xf32>
    %23 = arith.maximumf %21, %22 : vector<2x128xf32>
    %c0_19 = arith.constant 0 : index
    %c0_20 = arith.constant 0 : index
    %24 = vector.load %arg7[%c0_19, %c0_20] : memref<128x128xf32, #tpu.memory_space<vmem>>, vector<128x128xf32>
    %cst_21 = arith.constant dense<0.000000e+00> : vector<2x128xf32>
    %25 = tpu.matmul %23, %24, %cst_21 {dimension_numbers = #tpu.dot_dimension_numbers<[1], [0], [0], [1], [0, 0, 1, 1], [], []>} : vector<2x128xf32>, vector<128x128xf32>, vector<2x128xf32> -> vector<2x128xf32>
    %c0_22 = arith.constant 0 : index
    %c0_23 = arith.constant 0 : index
    %26 = vector.load %arg8[%c0_22, %c0_23] : memref<1x128xf32, #tpu.memory_space<vmem>>, vector<1x128xf32>
    %27 = vector.broadcast %26 : vector<1x128xf32> to vector<2x128xf32>
    %28 = arith.addf %25, %27 : vector<2x128xf32>
    %c0_24 = arith.constant 0 : index
    %c0_25 = arith.constant 0 : index
    %29 = vector.load %arg10[%c0_24, %c0_25] : memref<2x128xf32, #tpu.memory_space<vmem>>, vector<2x128xf32>
    tpu.vector_store %arg10[%c0_24, %c0_25], %28 {strides = array<i32>} : memref<2x128xf32, #tpu.memory_space<vmem>>, vector<2x128xf32>,
    %30 = vector.extract_strided_slice %28 {offsets = [0, 0], sizes = [2, 64], strides = [1, 1]} : vector<2x128xf32> to vector<2x64xf32>
    %31 = vector.extract_strided_slice %28 {offsets = [0, 64], sizes = [2, 64], strides = [1, 1]} : vector<2x128xf32> to vector<2x64xf32>
    %cst_26 = arith.constant 5.000000e-01 : f32
    %32 = vector.broadcast %cst_26 : f32 to vector<2x64xf32>
    %33 = arith.mulf %32, %31 : vector<2x64xf32>
    %34 = math.exp %33 : vector<2x64xf32>
    %c0_27 = arith.constant 0 : index
    %c0_28 = arith.constant 0 : index
    %35 = vector.load %arg9[%c0_27, %c0_28] : memref<2x64xf32, #tpu.memory_space<vmem>>, vector<2x64xf32>
    %36 = arith.mulf %34, %35 : vector<2x64xf32>
    %37 = arith.addf %30, %36 : vector<2x64xf32>
    %c0_29 = arith.constant 0 : index
    %c0_30 = arith.constant 0 : index
    %38 = vector.load %arg11[%c0_29, %c0_30] : memref<2x64xf32, #tpu.memory_space<vmem>>, vector<2x64xf32>
    tpu.vector_store %arg11[%c0_29, %c0_30], %37 {strides = array<i32>} : memref<2x64xf32, #tpu.memory_space<vmem>>, vector<2x64xf32>,
    %cst_31 = arith.constant 1.000000e+00 : f32
    %39 = vector.broadcast %cst_31 : f32 to vector<2x64xf32>
    %40 = arith.addf %39, %31 : vector<2x64xf32>
    %41 = arith.mulf %30, %30 : vector<2x64xf32>
    %42 = arith.subf %40, %41 : vector<2x64xf32>
    %43 = arith.mulf %34, %34 : vector<2x64xf32>
    %44 = arith.subf %42, %43 : vector<2x64xf32>
    %cst_32 = arith.constant -5.000000e-01 : f32
    %45 = vector.broadcast %cst_32 : f32 to vector<2x64xf32>
    %46 = arith.mulf %45, %44 : vector<2x64xf32>
    %cst_33 = arith.constant dense<0.000000e+00> : vector<2xf32>
    %47 = vector.multi_reduction <add>, %46, %cst_33 [1] : vector<2x64xf32> to vector<2xf32>
    %48 = vector.shape_cast %47 : vector<2xf32> to vector<2x1xf32>
    %cst_34 = arith.constant dense<0.000000e+00> : vector<1xf32>
    %49 = vector.multi_reduction <add>, %48, %cst_34 [0] : vector<2x1xf32> to vector<1xf32>
    %50 = vector.shape_cast %49 : vector<1xf32> to vector<1x1xf32>
    %cst_35 = arith.constant 1.280000e+02 : f32
    %51 = vector.broadcast %cst_35 : f32 to vector<1x1xf32>
    %52 = arith.divf %50, %51 : vector<1x1xf32>
    %c0_36 = arith.constant 0 : index
    %c0_37 = arith.constant 0 : index
    %53 = vector.load %arg12[%c0_36, %c0_37] : memref<1x1xf32, #tpu.memory_space<vmem>>, vector<1x1xf32>
    tpu.vector_store %arg12[%c0_36, %c0_37], %52 {strides = array<i32>} : memref<1x1xf32, #tpu.memory_space<vmem>>, vector<1x1xf32>,
    return
  }
}

</mosaic_0001>

<bundles_post_ra>
// kernel: task_cvae_forward.1
= control target key start
LH: loop header
LB: loop body
LE: loop exit
PB: predicated region body
PF: predicated region fallthrough
CT: control target
= control target key end

     0   :  { %18 = vsyncpa [#allocation3], 0  ;;  %s1410_s0 = inlined_call_operand.vmem [shape: f32[2,256], index: 0, kind: input, shape index: {}]   ;;  %s1411_s1 = inlined_call_operand.vmem [shape: f32[2,256], index: 1, kind: input, shape index: {}]   ;;  %s1412_s2 = inlined_call_operand.hbm [shape: f32[256,128], index: 2, kind: input, shape index: {}]   ;;  %s1413_s3 = inlined_call_operand.vmem [shape: f32[1,128], index: 3, kind: input, shape index: {}]   ;;  %s1414_s4 = inlined_call_operand.hbm [shape: f32[128,128], index: 4, kind: input, shape index: {}]   ;;  %s1415_s5 = inlined_call_operand.hbm [shape: f32[128,128], index: 5, kind: input, shape index: {}]   ;;  %s1416_s6 = inlined_call_operand.vmem [shape: f32[1,128], index: 6, kind: input, shape index: {}]   ;;  %s1417_s7 = inlined_call_operand.hbm [shape: f32[128,128], index: 7, kind: input, shape index: {}]   ;;  %s1418_s8 = inlined_call_operand.vmem [shape: f32[1,128], index: 8, kind: input, shape index: {}]   ;;  %s1419_s9 = inlined_call_operand.vmem [shape: f32[2,64], index: 9, kind: input, shape index: {}]   ;;  %s1420_s10 = inlined_call_operand.vmem [shape: f32[2,128], index: 10, kind: output, shape index: {0}]   ;;  %s1421_s11 = inlined_call_operand.hbm [shape: f32[2,64], index: 11, kind: output, shape index: {1}]   ;;  %s1422_s12 = inlined_call_operand.hbm [shape: f32[1,1], index: 12, kind: output, shape index: {2}]  }
   0x1   :  { %19 = vsyncpa [#allocation6], 0 }
   0x2   :  { %20 = vsyncpa [#allocation9], 0 }
   0x3   :  { %21 = vsyncpa [#allocation4], 0 }
   0x4   :  { %22 = vsyncpa [#allocation12], 0  ;;  %s1178_s21 = smov [#allocation5]   ;;  %s1179_s23 = smov [#allocation2]  }
   0x5   :  { %s46_s22 = sshll.u32 %s1178_s21, 4  ;;  %s32_s24 = sshll.u32 %s1179_s23, 4  ;;  %s47_s22 = int_to_ptr.vmem [resolvable:$true] %s46_s22  ;;  %s1255_s24 = int_to_ptr.vmem [resolvable:$true] %s32_s24 }
   0x6   :  { %s1036_s27 = scalar_lea.hbm %s1414_s4, 2048 }
   0x7   :  { %p1037_p0 = scmp.ne.s32.totalorder %s1414_s4, %s1036_s27  ;;  %p1040_p1 = scmp.lt.u32.totalorder %s1036_s27, %s1414_s4 }
   0x9   :  { %p1042_p2 = pnand %p1040_p1, %p1037_p0 }
   0xb   :  { %1045 = shalt.err (!%p1042_p2)
}
   0xc   :  { %s1046_s14 = scalar_lea.vmem %s47_s22, 2048  ;;  %p1051_p4 = scmp.lt.s32.totalorder %s47_s22, %s47_s22 }
   0xd   :  { %p1047_p3 = scmp.ne.s32.totalorder %s47_s22, %s1046_s14  ;;  %p1052_p5 = scmp.lt.s32.totalorder %s1046_s14, %s1046_s14 }
   0xf   :  { %p1053_p6 = por %p1052_p5, %p1051_p4 }
  0x11   :  { %p1054_p7 = pnand %p1053_p6, %p1047_p3 }
  0x13   :  { %1057 = shalt.err (!%p1054_p7)
}
  0x14   :  { %s1180_s15 = smov 128   ;;  %s1181_s16 = smov 8  }
  0x15   :  { %52 = dma.hbm_to_vmem [thread:$0]  %s1414_s4, 2048, %s47_s22, [#allocation6], %s1180_s15, %s1180_s15, %s1181_s16  }
  0x16   :  { %s1058_s21 = scalar_lea.hbm %s1412_s2, 4096 }
  0x17   :  { %p1059_p8 = scmp.ne.s32.totalorder %s1412_s2, %s1058_s21  ;;  %p1062_p9 = scmp.lt.u32.totalorder %s1058_s21, %s1412_s2 }
  0x19   :  { %p1064_p10 = pnand %p1062_p9, %p1059_p8 }
  0x1b   :  { %1067 = shalt.err (!%p1064_p10)
}
  0x1c   :  { %s1068_s28 = scalar_lea.vmem %s1255_s24, 4096  ;;  %p1073_p12 = scmp.lt.s32.totalorder %s1255_s24, %s1255_s24 }
  0x1d   :  { %p1069_p11 = scmp.ne.s32.totalorder %s1255_s24, %s1068_s28  ;;  %p1074_p13 = scmp.lt.s32.totalorder %s1068_s28, %s1068_s28 }
  0x1f   :  { %p1075_p0 = por %p1074_p13, %p1073_p12 }
  0x21   :  { %p1076_p1 = pnand %p1075_p0, %p1069_p11 }
  0x23   :  { %1079 = shalt.err (!%p1076_p1)
}
  0x24   :  { %38 = dma.hbm_to_vmem [thread:$0]  %s1412_s2, 4096, %s1255_s24, [#allocation3], %s1180_s15, %s1180_s15, %s1181_s16  }
  0x25   :  { %s1182_s29 = smov [#allocation7]   ;;  %s1183_s13 = smov [#allocation8]  }
  0x26   :  { %s58_s30 = sshll.u32 %s1182_s29, 4  ;;  %s72_s14 = sshll.u32 %s1183_s13, 4  ;;  %s59_s30 = int_to_ptr.vmem [resolvable:$true] %s58_s30  ;;  %s1292_s14 = int_to_ptr.vmem [resolvable:$true] %s72_s14 }
  0x27   :  { %s1080_s19 = scalar_lea.hbm %s1415_s5, 2048 }
  0x28   :  { %p1081_p2 = scmp.ne.s32.totalorder %s1415_s5, %s1080_s19  ;;  %p1084_p3 = scmp.lt.u32.totalorder %s1080_s19, %s1415_s5 }
  0x2a   :  { %p1086_p4 = pnand %p1084_p3, %p1081_p2 }
  0x2c   :  { %1089 = shalt.err (!%p1086_p4)
}
  0x2d   :  { %s1090_s2 = scalar_lea.vmem %s59_s30, 2048  ;;  %p1095_p6 = scmp.lt.s32.totalorder %s59_s30, %s59_s30 }
  0x2e   :  { %p1091_p5 = scmp.ne.s32.totalorder %s59_s30, %s1090_s2  ;;  %p1096_p7 = scmp.lt.s32.totalorder %s1090_s2, %s1090_s2 }
  0x30   :  { %p1097_p8 = por %p1096_p7, %p1095_p6 }
  0x32   :  { %p1098_p9 = pnand %p1097_p8, %p1091_p5 }
  0x34   :  { %1101 = shalt.err (!%p1098_p9)
}
  0x35   :  { %64 = dma.hbm_to_vmem [thread:$0]  %s1415_s5, 2048, %s59_s30, [#allocation6], %s1180_s15, %s1180_s15, %s1181_s16  }
  0x36   :  { %s1102_s4 = scalar_lea.hbm %s1417_s7, 2048 }
  0x37   :  { %p1103_p10 = scmp.ne.s32.totalorder %s1417_s7, %s1102_s4  ;;  %p1106_p11 = scmp.lt.u32.totalorder %s1102_s4, %s1417_s7 }
  0x39   :  { %p1108_p12 = pnand %p1106_p11, %p1103_p10 }
  0x3b   :  { %1111 = shalt.err (!%p1108_p12)
}
  0x3c   :  { %s1112_s18 = scalar_lea.vmem %s1292_s14, 2048  ;;  %p1117_p0 = scmp.lt.s32.totalorder %s1292_s14, %s1292_s14 }
  0x3d   :  { %p1113_p13 = scmp.ne.s32.totalorder %s1292_s14, %s1112_s18  ;;  %p1118_p1 = scmp.lt.s32.totalorder %s1112_s18, %s1112_s18 }
  0x3f   :  { %p1119_p2 = por %p1118_p1, %p1117_p0 }
  0x41   :  { %p1120_p3 = pnand %p1119_p2, %p1113_p13 }
  0x43   :  { %1123 = shalt.err (!%p1120_p3)
}
  0x44   :  { %78 = dma.hbm_to_vmem [thread:$0]  %s1417_s7, 2048, %s1292_s14, [#allocation9], %s1180_s15, %s1180_s15, %s1181_s16  }
  0x45   :  { %1168 = dma.done.wait [#allocation3], 4096  }
  0x46   :  { %1169 = vsyncadd [#allocation3], 4294963200 }
  0x47   :  { %1170 = dma.done.wait [#allocation6], 4096  }
  0x48   :  { %1171 = vsyncadd [#allocation6], 4294963200 }
  0x49   :  { %1172 = dma.done.wait [#allocation9], 2048  }
  0x4a   :  { %1173 = vsyncadd [#allocation9], 4294965248  ;;  %v111_v0 = vld [vmem:[#allocation2 + $0x80] sm:$0xff]  ;;  %v112_v1 = vld [vmem:[#allocation2 + $0x88] sm:$0xff]  ;;  %v1184_v59 = vmov 0.0|0.0   ;;  %vm1185_vm0 = vmmov 0  }
  0x4b   :  { %v95_v2 = vld [vmem:[#allocation2] sm:$0xff]  ;;  %v886_v3 = vpack.c.bf16 %v112_v1, %v111_v0  ;;  %v96_v4 = vld [vmem:[#allocation2 + $0x8] sm:$0xff]  ;;  %v113_v5 = vld [vmem:[#allocation2 + $0x90] sm:$0xff]  ;;  %s1187_s20 = smov 64   ;;  %vm589_vm1 = vcmask 517120  }
  0x4c   :  { %v114_v6 = vld [vmem:[#allocation2 + $0x98] sm:$0xff]  ;;  %v888_v7 = vpack.c.bf16 %v96_v4, %v95_v2  ;;  %v97_v9 = vld [vmem:[#allocation2 + $0x10] sm:$0xff]  ;;  %v115_v11 = vld [vmem:[#allocation2 + $0xa0] sm:$0xff] }
  0x4d   :  { %v890_v8 = vpack.c.bf16 %v114_v6, %v113_v5  ;;  %v98_v10 = vld [vmem:[#allocation2 + $0x18] sm:$0xff]  ;;  %887 = vmatprep.subr.bf16.mxu0 %v886_v3  ;;  %919 = vmatprep.subr.bf16.mxu1 %v886_v3  ;;  %v116_v12 = vld [vmem:[#allocation2 + $0xa8] sm:$0xff]  ;;  %v99_v15 = vld [vmem:[#allocation2 + $0x20] sm:$0xff] }
  0x4e   :  { %889 = vmatpush3.bf16.msra.mxu0 %v888_v7  ;;  %921 = vmatpush3.bf16.msra.mxu1 %v888_v7  ;;  %v892_v13 = vpack.c.bf16 %v98_v10, %v97_v9  ;;  %v894_v14 = vpack.c.bf16 %v116_v12, %v115_v11  ;;  %v100_v16 = vld [vmem:[#allocation2 + $0x28] sm:$0xff]  ;;  %v117_v17 = vld [vmem:[#allocation2 + $0xb0] sm:$0xff]  ;;  %v118_v18 = vld [vmem:[#allocation2 + $0xb8] sm:$0xff] }
  0x4f   :  { %891 = vmatprep.subr.bf16.mxu0 %v890_v8  ;;  %923 = vmatprep.subr.bf16.mxu1 %v890_v8  ;;  %v896_v19 = vpack.c.bf16 %v100_v16, %v99_v15  ;;  %v898_v20 = vpack.c.bf16 %v118_v18, %v117_v17  ;;  %v101_v21 = vld [vmem:[#allocation2 + $0x30] sm:$0xff]  ;;  %v102_v22 = vld [vmem:[#allocation2 + $0x38] sm:$0xff]  ;;  %v119_v23 = vld [vmem:[#allocation2 + $0xc0] sm:$0xff] }
  0x50   :  { %v120_v24 = vld [vmem:[#allocation2 + $0xc8] sm:$0xff]  ;;  %v1332_v25 = vld.sshfl [vmem:[%s1410_s0] sm:$0x33 pattern:$0x76325410]  ;;  %v900_v28 = vpack.c.bf16 %v102_v22, %v101_v21  ;;  %v121_v33 = vld [vmem:[#allocation2 + $0xd0] sm:$0xff] }
  0x51   :  { %v143_v26 = vcombine.high %v1332_v25, %v1332_v25  ;;  %v657_v27 = vld.sshfl [vmem:[%s1411_s1] sm:$0x33 pattern:$0x76325410]  ;;  %v902_v30 = vpack.c.bf16 %v120_v24, %v119_v23  ;;  %v104_v32 = vld [vmem:[#allocation2 + $0x48] sm:$0xff]  ;;  %v122_v34 = vld [vmem:[#allocation2 + $0xd8] sm:$0xff] }
  0x52   :  { %893 = vmatpush3.bf16.msra.mxu0 %v892_v13  ;;  %925 = vmatpush3.bf16.msra.mxu1 %v892_v13  ;;  %v226_v29 = vcombine.high %v657_v27, %v657_v27  ;;  %v103_v31 = vld [vmem:[#allocation2 + $0x40] sm:$0xff]  ;;  %v906_v36 = vpack.c.bf16 %v122_v34, %v121_v33  ;;  %v105_v37 = vld [vmem:[#allocation2 + $0x50] sm:$0xff]  ;;  %v106_v38 = vld [vmem:[#allocation2 + $0x58] sm:$0xff] }
  0x53   :  { %895 = vmatprep.subr.bf16.mxu0 %v894_v14  ;;  %927 = vmatprep.subr.bf16.mxu1 %v894_v14  ;;  %v904_v35 = vpack.c.bf16 %v104_v32, %v103_v31  ;;  %v123_v39 = vld [vmem:[#allocation2 + $0xe0] sm:$0xff]  ;;  %v124_v40 = vld [vmem:[#allocation2 + $0xe8] sm:$0xff]  ;;  %v908_v41 = vpack.c.bf16 %v106_v38, %v105_v37  ;;  %v125_v45 = vld [vmem:[#allocation2 + $0xf0] sm:$0xff]  ;;  %v1186_v37 = vmov 0.0  }
  0x54   :  { %210 = vmatprep.mubr.f32.mxu0 %v143_v26  ;;  %293 = vmatprep.mubr.f32.mxu1 %v226_v29  ;;  %v910_v42 = vpack.c.bf16 %v124_v40, %v123_v39  ;;  %v107_v43 = vld [vmem:[#allocation2 + $0x60] sm:$0xff]  ;;  %v108_v44 = vld [vmem:[#allocation2 + $0x68] sm:$0xff]  ;;  %v126_v46 = vld [vmem:[#allocation2 + $0xf8] sm:$0xff] }
  0x55   :  { %v912_v47 = vpack.c.bf16 %v108_v44, %v107_v43  ;;  %v914_v48 = vpack.c.bf16 %v126_v46, %v125_v45  ;;  %v109_v49 = vld [vmem:[#allocation2 + $0x70] sm:$0xff]  ;;  %v110_v50 = vld [vmem:[#allocation2 + $0x78] sm:$0xff]  ;;  %v316_v52 = vld [vmem:[#allocation7] sm:$0xff] }
  0x56   :  { %897 = vmatpush3.bf16.msra.mxu0 %v896_v19  ;;  %929 = vmatpush3.bf16.msra.mxu1 %v896_v19  ;;  %v916_v51 = vpack.c.bf16 %v110_v50, %v109_v49  ;;  %v317_v53 = vld [vmem:[#allocation7 + $0x8] sm:$0xff]  ;;  %v300_v54 = vld [vmem:[#allocation5] sm:$0xff]  ;;  %v318_v58 = vld [vmem:[#allocation7 + $0x10] sm:$0xff] }
  0x57   :  { %899 = vmatprep.subr.bf16.mxu0 %v898_v20  ;;  %931 = vmatprep.subr.bf16.mxu1 %v898_v20  ;;  %v301_v55 = vld [vmem:[#allocation5 + $0x8] sm:$0xff]  ;;  %v951_v56 = vpack.c.bf16 %v317_v53, %v316_v52  ;;  %v319_v60 = vld [vmem:[#allocation7 + $0x18] sm:$0xff]  ;;  %v302_v61 = vld [vmem:[#allocation5 + $0x10] sm:$0xff] }
  0x58   :  { %v975_v57 = vpack.c.bf16 %v301_v55, %v300_v54  ;;  %v303_v62 = vld [vmem:[#allocation5 + $0x18] sm:$0xff]  ;;  %v954_v63 = vpack.c.bf16 %v319_v60, %v318_v58  ;;  %v320_v1 = vld [vmem:[#allocation7 + $0x20] sm:$0xff]  ;;  %v321_v2 = vld [vmem:[#allocation7 + $0x28] sm:$0xff] }
  0x59   :  { %v978_v0 = vpack.c.bf16 %v303_v62, %v302_v61  ;;  %v304_v3 = vld [vmem:[#allocation5 + $0x20] sm:$0xff]  ;;  %v305_v4 = vld [vmem:[#allocation5 + $0x28] sm:$0xff]  ;;  %v957_v5 = vpack.c.bf16 %v321_v2, %v320_v1  ;;  %v322_v7 = vld [vmem:[#allocation7 + $0x30] sm:$0xff] }
  0x5a   :  { %901 = vmatpush3.bf16.msra.mxu0 %v900_v28  ;;  %933 = vmatpush3.bf16.msra.mxu1 %v900_v28  ;;  %v981_v6 = vpack.c.bf16 %v305_v4, %v304_v3  ;;  %v323_v8 = vld [vmem:[#allocation7 + $0x38] sm:$0xff]  ;;  %v306_v9 = vld [vmem:[#allocation5 + $0x30] sm:$0xff]  ;;  %v324_v13 = vld [vmem:[#allocation7 + $0x40] sm:$0xff] }
  0x5b   :  { %903 = vmatprep.subr.bf16.mxu0 %v902_v30  ;;  %935 = vmatprep.subr.bf16.mxu1 %v902_v30  ;;  %v307_v10 = vld [vmem:[#allocation5 + $0x38] sm:$0xff]  ;;  %v960_v11 = vpack.c.bf16 %v323_v8, %v322_v7  ;;  %v325_v14 = vld [vmem:[#allocation7 + $0x48] sm:$0xff]  ;;  %v308_v15 = vld [vmem:[#allocation5 + $0x40] sm:$0xff] }
  0x5c   :  { %v984_v12 = vpack.c.bf16 %v307_v10, %v306_v9  ;;  %v309_v16 = vld [vmem:[#allocation5 + $0x48] sm:$0xff]  ;;  %v963_v17 = vpack.c.bf16 %v325_v14, %v324_v13  ;;  %v326_v19 = vld [vmem:[#allocation7 + $0x50] sm:$0xff]  ;;  %v327_v20 = vld [vmem:[#allocation7 + $0x58] sm:$0xff] }
  0x5d   :  { %v987_v18 = vpack.c.bf16 %v309_v16, %v308_v15  ;;  %v310_v21 = vld [vmem:[#allocation5 + $0x50] sm:$0xff]  ;;  %v311_v22 = vld [vmem:[#allocation5 + $0x58] sm:$0xff]  ;;  %v966_v23 = vpack.c.bf16 %v327_v20, %v326_v19  ;;  %v329_v26 = vld [vmem:[#allocation7 + $0x68] sm:$0xff] }
  0x5e   :  { %905 = vmatpush3.bf16.msra.mxu0 %v904_v35  ;;  %937 = vmatpush3.bf16.msra.mxu1 %v904_v35  ;;  %v990_v24 = vpack.c.bf16 %v311_v22, %v310_v21  ;;  %v313_v29 = vld [vmem:[#allocation5 + $0x68] sm:$0xff]  ;;  %v330_v31 = vld [vmem:[#allocation7 + $0x70] sm:$0xff]  ;;  %v331_v32 = vld [vmem:[#allocation7 + $0x78] sm:$0xff] }
  0x5f   :  { %907 = vmatprep.subr.bf16.mxu0 %v906_v36  ;;  %939 = vmatprep.subr.bf16.mxu1 %v906_v36  ;;  %v314_v33 = vld [vmem:[#allocation5 + $0x70] sm:$0xff]  ;;  %v972_v34 = vpack.c.bf16 %v331_v32, %v330_v31  ;;  %v315_v35 = vld [vmem:[#allocation5 + $0x78] sm:$0xff]  ;;  %v655_v40 = vld [vmem:[%s1413_s3] ss:$0 sm:$0xff] }
  0x60   :  { %v996_v36 = vpack.c.bf16 %v315_v35, %v314_v33  ;;  %v481_v45 = vld [vmem:[#allocation8] sm:$0xff]  ;;  %v482_v46 = vld [vmem:[#allocation8 + $0x8] sm:$0xff]  ;;  %v483_v52 = vld [vmem:[#allocation8 + $0x10] sm:$0xff] }
  0x61   :  { %v999_v49 = vpack.c.bf16 %v482_v46, %v481_v45  ;;  %v484_v53 = vld [vmem:[#allocation8 + $0x18] sm:$0xff]  ;;  %v485_v55 = vld [vmem:[#allocation8 + $0x20] sm:$0xff]  ;;  %v487_v58 = vld [vmem:[#allocation8 + $0x30] sm:$0xff] }
  0x62   :  { %909 = vmatpush3.bf16.msra.mxu0 %v908_v41  ;;  %941 = vmatpush3.bf16.msra.mxu1 %v908_v41  ;;  %v1002_v54 = vpack.c.bf16 %v484_v53, %v483_v52  ;;  %v488_v60 = vld [vmem:[#allocation8 + $0x38] sm:$0xff]  ;;  %v489_v62 = vld [vmem:[#allocation8 + $0x40] sm:$0xff]  ;;  %v491_v1 = vld [vmem:[#allocation8 + $0x50] sm:$0xff] }
  0x63   :  { %911 = vmatprep.subr.bf16.mxu0 %v910_v42  ;;  %943 = vmatprep.subr.bf16.mxu1 %v910_v42  ;;  %v1008_v61 = vpack.c.bf16 %v488_v60, %v487_v58  ;;  %v492_v2 = vld [vmem:[#allocation8 + $0x58] sm:$0xff]  ;;  %v493_v4 = vld [vmem:[#allocation8 + $0x60] sm:$0xff]  ;;  %v495_v7 = vld [vmem:[#allocation8 + $0x70] sm:$0xff] }
  0x64   :  { %v1014_v3 = vpack.c.bf16 %v492_v2, %v491_v1  ;;  %v496_v8 = vld [vmem:[#allocation8 + $0x78] sm:$0xff]  ;;  %v578_v10 = vld [vmem:[%s1419_s9] sm:$0x3] }
  0x65   :  { %v1020_v9 = vpack.c.bf16 %v496_v8, %v495_v7  ;;  %580 = vrot.lane.b32.xlu1 %v578_v10, %s1187_s20  ;;  %v658_v13 = vld [vmem:[%s1416_s6] ss:$0 sm:$0xff]  ;;  %s1188_s6 = smov [#allocation10]  }
  0x66   :  { %913 = vmatpush3.bf16.msra.mxu0 %v912_v47  ;;  %945 = vmatpush3.bf16.msra.mxu1 %v912_v47 }
  0x67   :  { %915 = vmatprep.subr.bf16.mxu0 %v914_v48  ;;  %947 = vmatprep.subr.bf16.mxu1 %v914_v48 }
  0x6a   :  { %917 = vmatpush3.bf16.msra.mxu0 %v916_v51  ;;  %949 = vmatpush3.bf16.msra.mxu1 %v916_v51 }
  0x6b   :  { %950 = vmatprep.subr.bf16.mxu0 %v1184_v59  ;;  %974 = vmatprep.subr.bf16.mxu1 %v1184_v59 }
  0x6d   :  { %211 = vmatmul.mubr.f32.vlgmr.msra.gmra.mrb[0].mxu0 %v1332_v25  ;;  %294 = vmatmul.mubr.f32.vlgmr.msra.gmra.mrb[0].mxu1 %v657_v27  ;;  %v328_v25 = vld [vmem:[#allocation7 + $0x60] sm:$0xff] }
  0x6e   :  { %952 = vmatpush3.bf16.msra.mxu0 %v951_v56  ;;  %976 = vmatpush3.bf16.msra.mxu1 %v975_v57  ;;  %v312_v27 = vld [vmem:[#allocation5 + $0x60] sm:$0xff]  ;;  %v969_v28 = vpack.c.bf16 %v329_v26, %v328_v25  ;;  %v486_v56 = vld [vmem:[#allocation8 + $0x28] sm:$0xff] }
  0x6f   :  { %953 = vmatprep.subr.bf16.mxu0 %v1184_v59  ;;  %977 = vmatprep.subr.bf16.mxu1 %v1184_v59  ;;  %v993_v30 = vpack.c.bf16 %v313_v29, %v312_v27  ;;  %v1005_v57 = vpack.c.bf16 %v486_v56, %v485_v55 }
  0x70   :  { %813 = vmatprep.mubr.msk.f32.mxu0 %vm1185_vm0, %v1186_v37  ;;  %848 = vmatprep.mubr.msk.f32.mxu1 %vm1185_vm0, %v1186_v37 }
  0x72   :  { %955 = vmatpush3.bf16.msra.mxu0 %v954_v63  ;;  %979 = vmatpush3.bf16.msra.mxu1 %v978_v0  ;;  %v490_v63 = vld [vmem:[#allocation8 + $0x48] sm:$0xff] }
  0x73   :  { %956 = vmatprep.subr.bf16.mxu0 %v1184_v59  ;;  %980 = vmatprep.subr.bf16.mxu1 %v1184_v59  ;;  %v1011_v0 = vpack.c.bf16 %v490_v63, %v489_v62 }
  0x76   :  { %958 = vmatpush3.bf16.msra.mxu0 %v957_v5  ;;  %982 = vmatpush3.bf16.msra.mxu1 %v981_v6  ;;  %v494_v5 = vld [vmem:[#allocation8 + $0x68] sm:$0xff] }
  0x77   :  { %959 = vmatprep.subr.bf16.mxu0 %v1184_v59  ;;  %983 = vmatprep.subr.bf16.mxu1 %v1184_v59  ;;  %v1017_v6 = vpack.c.bf16 %v494_v5, %v493_v4 }
  0x7a   :  { %961 = vmatpush3.bf16.msra.mxu0 %v960_v11  ;;  %985 = vmatpush3.bf16.msra.mxu1 %v984_v12 }
  0x7b   :  { %962 = vmatprep.subr.bf16.mxu0 %v1184_v59  ;;  %986 = vmatprep.subr.bf16.mxu1 %v1184_v59 }
  0x7e   :  { %964 = vmatpush3.bf16.msra.mxu0 %v963_v17  ;;  %988 = vmatpush3.bf16.msra.mxu1 %v987_v18  ;;  %v659_v18 = vld [vmem:[%s1418_s8] ss:$0 sm:$0xff]  ;;  %s628_s8 = sshll.u32 %s1188_s6, 4  ;;  %s629_s8 = int_to_ptr.vmem [resolvable:$true] %s628_s8 }
  0x7f   :  { %965 = vmatprep.subr.bf16.mxu0 %v1184_v59  ;;  %989 = vmatprep.subr.bf16.mxu1 %v1184_v59  ;;  %p1129_p5 = scmp.lt.s32.totalorder %s629_s8, %s629_s8 }
  0x82   :  { %967 = vmatpush3.bf16.msra.mxu0 %v966_v23  ;;  %991 = vmatpush3.bf16.msra.mxu1 %v990_v24 }
  0x83   :  { %968 = vmatprep.subr.bf16.mxu0 %v1184_v59  ;;  %992 = vmatprep.subr.bf16.mxu1 %v1184_v59 }
  0x86   :  { %970 = vmatpush3.bf16.msra.mxu0 %v969_v28  ;;  %994 = vmatpush3.bf16.msra.mxu1 %v993_v30 }
  0x87   :  { %971 = vmatprep.subr.bf16.mxu0 %v1184_v59  ;;  %995 = vmatprep.subr.bf16.mxu1 %v1184_v59 }
  0x8a   :  { %973 = vmatpush3.bf16.msra.mxu0 %v972_v34  ;;  %997 = vmatpush3.bf16.msra.mxu1 %v996_v36 }
  0x8b   :  { %998 = vmatprep.subr.bf16.mxu0 %v1184_v59 }
  0xd7   :  { %v581_v32 = vpop.permute.xlu1 %580 }
 0x140   :  { %v692_v38 = vpop.f32.mrb[0].mxu0  ;;  %v727_v39 = vpop.f32.mrb[0].mxu1 }
 0x141   :  { %v693_v41 = vpop.f32.mrb[1].mxu0  ;;  %v728_v42 = vpop.f32.mrb[1].mxu1 }
 0x142   :  { %v694_v43 = vadd.f32 %v693_v41, %v692_v38  ;;  %v729_v44 = vadd.f32 %v728_v42, %v727_v39 }
 0x144   :  { %v213_v47 = vadd.f32 %v694_v43, %v655_v40  ;;  %v296_v48 = vadd.f32 %v729_v44, %v655_v40 }
 0x146   :  { %v216_v50 = vmax.f32 %v213_v47, 0.0  ;;  %v299_v51 = vmax.f32 %v296_v48, 0.0 }
 0x148   :  { %814 = vmatmul.mubr.f32.vlgmr.msra.gmra.mrb[2].mxu0 %v299_v51  ;;  %849 = vmatmul.mubr.f32.vlgmr.msra.gmra.mrb[2].mxu1 %v216_v50 }
 0x149   :  { %1000 = vmatpush3.bf16.msra.mxu0 %v999_v49  ;;  %883 = vmatprep.mubr.msk.f32.mxu0 %vm1185_vm0, %v1186_v37 }
 0x14a   :  { %1001 = vmatprep.subr.bf16.mxu0 %v1184_v59 }
 0x14d   :  { %1003 = vmatpush3.bf16.msra.mxu0 %v1002_v54 }
 0x14e   :  { %1004 = vmatprep.subr.bf16.mxu0 %v1184_v59 }
 0x151   :  { %1006 = vmatpush3.bf16.msra.mxu0 %v1005_v57 }
 0x152   :  { %1007 = vmatprep.subr.bf16.mxu0 %v1184_v59 }
 0x155   :  { %1009 = vmatpush3.bf16.msra.mxu0 %v1008_v61 }
 0x156   :  { %1010 = vmatprep.subr.bf16.mxu0 %v1184_v59 }
 0x159   :  { %1012 = vmatpush3.bf16.msra.mxu0 %v1011_v0 }
 0x15a   :  { %1013 = vmatprep.subr.bf16.mxu0 %v1184_v59 }
 0x15d   :  { %1015 = vmatpush3.bf16.msra.mxu0 %v1014_v3 }
 0x15e   :  { %1016 = vmatprep.subr.bf16.mxu0 %v1184_v59 }
 0x161   :  { %1018 = vmatpush3.bf16.msra.mxu0 %v1017_v6 }
 0x162   :  { %1019 = vmatprep.subr.bf16.mxu0 %v1184_v59 }
 0x165   :  { %1021 = vmatpush3.bf16.msra.mxu0 %v1020_v9 }
 0x21b   :  { %v398_v11 = vpop.f32.mrb[2].mxu0  ;;  %v468_v12 = vpop.f32.mrb[2].mxu1 }
 0x21c   :  { %v469_v14 = vadd.f32 %v468_v12, %v398_v11  ;;  %v815_v15 = vpop.f32.mrb[3].mxu0  ;;  %v850_v59 = vpop.f32.mrb[3].mxu1 }
 0x21e   :  { %v479_v16 = vadd.f32 %v658_v13, %v469_v14 }
 0x220   :  { %v480_v17 = vmax.f32 %v479_v16, 0.0 }
 0x222   :  { %884 = vmatmul.mubr.f32.vlgmr.msra.gmra.mrb[4].mxu0 %v480_v17 }
 0x2f5   :  { %v570_v19 = vpop.f32.mrb[4].mxu0 }
 0x2f6   :  { %v571_v20 = vadd.f32 %v659_v18, %v570_v19  ;;  %v885_v21 = vpop.f32.mrb[5].mxu0 }
 0x2f8   :  { %574 = vst [vmem:[%s1420_s10] sm:$0x3] %v571_v20  ;;  %v592_v22 = vmul.f32 %v571_v20, %v571_v20  ;;  %v575_v23 = vmul.f32 0.5, %v571_v20  ;;  %v591_v26 = vadd.f32 1.0, %v571_v20  ;;  %s1124_s10 = scalar_lea.vmem %s629_s8, 32 }
 0x2f9   :  { %p1125_p4 = scmp.ne.s32.totalorder %s629_s8, %s1124_s10  ;;  %p1130_p6 = scmp.lt.s32.totalorder %s1124_s10, %s1124_s10 }
 0x2fa   :  { %594 = vrot.lane.b32.xlu0 %v592_v22, %s1187_s20  ;;  %v576_v24 = vmul.f32 1.442695, %v575_v23 }
 0x2fb   :  { %p1131_p7 = por %p1130_p6, %p1129_p5 }
 0x2fc   :  { %1034 = vpow2.f32 %v576_v24 }
 0x2fd   :  { %p1132_p8 = pnand %p1131_p7, %p1125_p4 }
 0x306   :  { %v1035_v25 = vpop.eup %1034 }
 0x307   :  { %v598_v29 = vmul.f32 %v1035_v25, %v1035_v25  ;;  %v583_v33 = vmul.f32 %v1035_v25, %v581_v32 }
 0x36c   :  { %v595_v27 = vpop.permute.xlu0 %594 }
 0x36d   :  { %v597_v28 = vsub.f32 %v591_v26, %v595_v27 }
 0x36f   :  { %v599_v30 = vsub.f32 %v597_v28, %v598_v29 }
 0x371   :  { %v600_v31 = vmul.f32 -0.5, %v599_v30 }
 0x373   :  { %602 = vrot.lane.b32.xlu0 %v600_v31, %s1187_s20 }
 0x377   :  { %585 = vrot.lane.b32.xlu0 %v583_v33, %s1187_s20 }
 0x3e5   :  { %v603_v34 = vpop.permute.xlu0 %602 }
 0x3e6   :  { %v605_v35 = vsel %vm589_vm1, %v603_v34, 0.0 }
 0x3e7   :  { %606 = vadd.xlane.f32.xlu1 %v605_v35 }
 0x3e9   :  { %v586_v36 = vpop.permute.xlu0 %585 }
 0x3ea   :  { %v588_v37 = vadd.f32 %v586_v36, %v571_v20 }
 0x3ec   :  { %590 = vst.msk [vmem:[#allocation10] sm:$0x3] %vm589_vm1, %v588_v37 }
 0x3ed   :  { %1135 = shalt.err (!%p1132_p8)
}
 0x3ee   :  { %s1136_s28 = scalar_lea.hbm %s1421_s11, 32 }
 0x3ef   :  { %p1137_p9 = scmp.ne.s32.totalorder %s1421_s11, %s1136_s28  ;;  %p1140_p10 = scmp.lt.u32.totalorder %s1136_s28, %s1421_s11 }
 0x3f1   :  { %p1142_p11 = pnand %p1140_p10, %p1137_p9 }
 0x3f3   :  { %1145 = shalt.err (!%p1142_p11)
}
 0x3f4   :  { %631 = dma.vmem_to_hbm [thread:$0]  %s629_s8, 32, %s1421_s11, [#allocation4]   ;;  %vm608_vm2 = vcmask 1041408   ;;  %vm618_vm3 = vcmask 0  }
 0x3f5   :  { %s1189_s5 = smov [#allocation11]  }
 0x3f6   :  { %s638_s30 = sshll.u32 %s1189_s5, 4  ;;  %s639_s30 = int_to_ptr.vmem [resolvable:$true] %s638_s30 }
 0x3f7   :  { %s1146_s7 = scalar_lea.vmem %s639_s30, 16  ;;  %s1150_s15 = scalar_lea.vmem %s639_s30, 32 }
 0x3f8   :  { %p1147_p12 = scmp.ne.s32.totalorder %s639_s30, %s1146_s7  ;;  %p1151_p13 = scmp.lt.s32.totalorder %s639_s30, %s639_s30 }
 0x3f9   :  { %p1152_p0 = scmp.lt.s32.totalorder %s1150_s15, %s1146_s7 }
 0x3fb   :  { %p1153_p1 = por %p1152_p0, %p1151_p13 }
 0x3fd   :  { %p1154_p2 = pnand %p1153_p1, %p1147_p12 }
 0x474   :  { %v607_v38 = vpop.xlane.xlu1 %606 }
 0x475   :  { %v609_v39 = vsel %vm608_vm2, %v607_v38, 0.0 }
 0x476   :  { %v610_v40 = vrot.slane %v609_v39, 4 }
 0x478   :  { %v611_v41 = vadd.f32 %v610_v40, %v609_v39 }
 0x47a   :  { %v612_v42 = vrot.slane %v611_v41, 2 }
 0x47c   :  { %v613_v43 = vadd.f32 %v612_v42, %v611_v41 }
 0x47e   :  { %v614_v44 = vrot.slane %v613_v43, 1 }
 0x480   :  { %v615_v45 = vadd.f32 %v614_v44, %v613_v43 }
 0x482   :  { %v617_v46 = vmul.f32 0.0078125, %v615_v45 }
 0x484   :  { %619 = vst.msk [vmem:[#allocation11] sm:$0x1] %vm618_vm3, %v617_v46 }
 0x485   :  { %1157 = shalt.err (!%p1154_p2)
}
 0x486   :  { %s1158_s14 = scalar_lea.hbm %s1422_s12, 16 }
 0x487   :  { %p1159_p3 = scmp.ne.s32.totalorder %s1422_s12, %s1158_s14  ;;  %p1162_p4 = scmp.lt.u32.totalorder %s1158_s14, %s1422_s12 }
 0x489   :  { %p1164_p5 = pnand %p1162_p4, %p1159_p3 }
 0x48b   :  { %1167 = shalt.err (!%p1164_p5)
}
 0x48c   :  { %641 = dma.vmem_to_hbm [thread:$0]  %s639_s30, 16, %s1422_s12, [#allocation12]  }
 0x48d   :  { %1174 = dma.done.wait [#allocation4], 32  }
 0x48e   :  { %1175 = vsyncadd [#allocation4], 4294967264 }
 0x48f   :  { %1176 = dma.done.wait [#allocation12], 16  }
 0x490   :  { %1177 = vsyncadd [#allocation12], 4294967280 }
 0x491   :  { %650 = vsyncpa [#allocation3], 1 }
 0x492   :  { %651 = vsyncpa [#allocation6], 1 }
 0x493   :  { %652 = vsyncpa [#allocation9], 1 }
 0x494   :  { %653 = vsyncpa [#allocation4], 1 }
 0x495   :  { %654 = vsyncpa [#allocation12], 1 }

</bundles_post_ra>
